<compile_context>
chip_gen: v6e
topology: v6e:2x2x1
jax: 0.10.0
libtpu: 0.0.40
codegen_flags: <defaults>
</compile_context>

<pallas_src>
import jax
import jax.numpy as jnp
from jax.experimental import pallas as pl
from jax.experimental.pallas import tpu as pltpu


def _dma_identity_kernel(x_hbm_ref, o_hbm_ref, sem):
    # One whole-array HBM->HBM DMA; no VMEM staging, no grid steps.
    cp = pltpu.make_async_copy(x_hbm_ref, o_hbm_ref, sem)
    cp.start()
    cp.wait()


def none_transform(x, data=None, *, force_pallas=False):
    """Pallas equivalent of NoneTransform.forward: returns x (identity).

    `data` is accepted for signature parity but unused, matching PyTorch.
    """
    del data  # unused, as in the PyTorch module

    if not force_pallas:
        # Identity is zero-compute: never pay 2x nbytes of HBM traffic for it.
        return x

    # Materialize an explicit copy via a single HBM->HBM DMA.
    return pl.pallas_call(
        _dma_identity_kernel,
        out_shape=jax.ShapeDtypeStruct(x.shape, x.dtype),
        in_specs=[pl.BlockSpec(memory_space=pl.ANY)],
        out_specs=pl.BlockSpec(memory_space=pl.ANY),
        scratch_shapes=[pltpu.SemaphoreType.DMA(())],
    )(x)


if __name__ == "__main__":
    key = jax.random.PRNGKey(0)
    kx, kd = jax.random.split(key)

    # NCHW input consistent with a typical image-model transform.
    x = jax.random.normal(kx, (2, 4, 16, 16), dtype=jnp.float32)
    data = {"aux": jax.random.normal(kd, (2, 8), dtype=jnp.float32)}  # ignored

    # Default path: pure trace-level identity, no kernel launch at all.
    y_fast = jax.block_until_ready(none_transform(x, data))
    assert y_fast.shape == x.shape and y_fast.dtype == x.dtype
    assert bool(jnp.all(y_fast == x))

    # Forced Pallas path: single HBM->HBM DMA copy of the whole array.
    y_kernel = jax.block_until_ready(none_transform(x, data, force_pallas=True))
    assert y_kernel.shape == x.shape and y_kernel.dtype == x.dtype
    assert bool(jnp.all(y_kernel == x))

    # Forced path on a different dtype / odd shape to confirm the DMA path has
    # no lane-density or sublane-packing constraints.
    x_bf16 = jax.random.normal(kd, (3, 5, 17), dtype=jnp.float32).astype(jnp.bfloat16)
    y_bf16 = jax.block_until_ready(none_transform(x_bf16, None, force_pallas=True))
    assert y_bf16.shape == x_bf16.shape and y_bf16.dtype == x_bf16.dtype
    assert bool(jnp.all(y_bf16 == x_bf16))

    # Slightly larger forced case (still small) exercising the same single-DMA path.
    x_big = jax.random.normal(kd, (2, 4, 32, 64), dtype=jnp.float32)
    y_big = jax.block_until_ready(none_transform(x_big, None, force_pallas=True))
    assert y_big.shape == x_big.shape and y_big.dtype == x_big.dtype
    assert bool(jnp.all(y_big == x_big))

    print("KERNEL_OK")
</pallas_src>

<mosaic_0001>
module attributes {stable_mosaic.version = 11 : i64} {
  func.func @_dma_identity_kernel(%arg0: memref<2x4x16x16xf32, #tpu.memory_space<any>>, %arg1: memref<2x4x16x16xf32, #tpu.memory_space<any>>, %arg2: memref<!tpu.dma_semaphore, #tpu.memory_space<semaphore_mem>>) attributes {dimension_semantics = [], scalar_prefetch = 0 : i64, scratch_operands = 1 : i64, tpu.core_type = #tpu.core_type<tc>} {
    tpu.enqueue_dma source(%arg0 : memref<2x4x16x16xf32, #tpu.memory_space<any>>) target(%arg1 : memref<2x4x16x16xf32, #tpu.memory_space<any>>) target_semaphore(%arg2 : memref<!tpu.dma_semaphore, #tpu.memory_space<semaphore_mem>>)
    tpu.wait_dma2 semaphore(%arg2 : memref<!tpu.dma_semaphore, #tpu.memory_space<semaphore_mem>>) src(%arg0 : memref<2x4x16x16xf32, #tpu.memory_space<any>>) dst(%arg1 : memref<2x4x16x16xf32, #tpu.memory_space<any>>)
    return
  }
}

</mosaic_0001>

<bundles_post_ra>
// kernel: tpu_custom_call.1
= control target key start
LH: loop header
LB: loop body
LE: loop exit
PB: predicated region body
PF: predicated region fallthrough
CT: control target
= control target key end

     0   :  { %s30_s6 = smov [#allocation2]   ;;  %s31_s7 = smov 131072   ;;  %s49_s0 = inlined_call_operand.hbm [shape: f32[2,4,16,16], index: 0, kind: input, shape index: {}]   ;;  %s50_s1 = inlined_call_operand.hbm [shape: f32[2,4,16,16], index: 1, kind: output, shape index: {}]  }
   0x1   :  { %s32_s8 = smov 0  }
   0x2   :  { %12 = dma.general %s49_s0, 2048, %s50_s1, %s30_s6, %s31_s7, [#allocation4], %s32_s8, 0  }
   0x3   :  { %28 = dma.done.wait [#allocation2], 2048 }
   0x4   :  { %29 = vsyncadd [#allocation2], 4294965248 }
   0x5   :  { %18 = vsyncmov [#allocation2] }
   0x8   :  { %s19_s13 = vpop.sfrf %18 }
   0x9   :  { %p24_p0 = scmp.ne.s32.totalorder %s19_s13, 0 }
   0xb   :  { %23 = shalt.err (%p24_p0)  }

</bundles_post_ra>
